<compile_context>
chip_gen: v5e
topology: v5e:2x2
jax: 0.10.0
libtpu: 0.0.40
codegen_flags: <defaults>
</compile_context>

<pallas_src>
import functools

import jax
import jax.numpy as jnp
import numpy as np
from jax.experimental import pallas as pl
from jax.experimental.pallas import tpu as pltpu


def layernorm_kernel(x_ref, g_ref, b_ref, o_ref, *, features, eps):
    x = x_ref[...].astype(jnp.float32)                 # (rows_tile, F)
    f = np.float32(features)

    # Single-pass per-row statistics (reduction along lanes -> XLU).
    s1 = jnp.sum(x, axis=-1, keepdims=True)
    s2 = jnp.sum(x * x, axis=-1, keepdims=True)
    mean = s1 / f
    # Unbiased variance (torch.Tensor.std default divides by N-1).
    var = (s2 - f * mean * mean) / np.float32(features - 1)
    var = jnp.maximum(var, 0.0)                        # guard fp cancellation
    std = jnp.sqrt(var)
    inv = 1.0 / (std + np.float32(eps))                # eps added to std (spec)

    out = g_ref[...] * ((x - mean) * inv) + b_ref[...]
    o_ref[...] = out.astype(o_ref.dtype)


def _pick_block_rows(rows):
    """Largest reasonable sublane tile: multiple of 8, ~512 rows, <= rows."""
    if rows % 8 != 0:
        # Fall back to a single full-extent block (always legal).
        return rows
    br = min(rows, 512)
    br -= br % 8
    return max(br, 8)


def layer_norm(x, gamma, beta, eps=1e-6, block_rows=None):
    """x: (..., F).  gamma, beta: (F,).  Returns same shape/dtype as x."""
    features = x.shape[-1]
    lead = x.shape[:-1]
    rows = int(np.prod(lead)) if lead else 1
    x2 = x.reshape(rows, features)                     # layout-preserving view

    if block_rows is None:
        block_rows = _pick_block_rows(rows)
    block_rows = min(block_rows, rows)

    grid = (pl.cdiv(rows, block_rows),)

    out = pl.pallas_call(
        functools.partial(layernorm_kernel, features=features, eps=eps),
        out_shape=jax.ShapeDtypeStruct((rows, features), x.dtype),
        grid=grid,
        in_specs=[
            pl.BlockSpec((block_rows, features), lambda i: (i, 0)),
            pl.BlockSpec((1, features), lambda i: (0, 0)),
            pl.BlockSpec((1, features), lambda i: (0, 0)),
        ],
        out_specs=pl.BlockSpec((block_rows, features), lambda i: (i, 0)),
        compiler_params=pltpu.CompilerParams(
            dimension_semantics=("parallel",)),       # rows are independent
    )(x2, gamma.reshape(1, features), beta.reshape(1, features))

    return out.reshape(x.shape)


def layer_norm_reference(x, gamma, beta, eps=1e-6):
    """Pure-JAX reference with identical (PyTorch) semantics."""
    mean = x.mean(axis=-1, keepdims=True)
    std = jnp.std(x, axis=-1, keepdims=True, ddof=1)   # unbiased, like torch.std
    return gamma * (x - mean) / (std + eps) + beta


if __name__ == "__main__":
    # Small shapes consistent with the module: batch=2, seq=8, hidden=32.
    B, S, F = 2, 8, 32

    key = jax.random.PRNGKey(0)
    k_x, k_g, k_b = jax.random.split(key, 3)

    x = jax.random.normal(k_x, (B, S, F), dtype=jnp.float32)
    # Module inits gamma=1, beta=0; perturb deterministically so the affine
    # path is actually exercised.
    gamma = 1.0 + 0.1 * jax.random.normal(k_g, (F,), dtype=jnp.float32)
    beta = 0.1 * jax.random.normal(k_b, (F,), dtype=jnp.float32)

    # block_rows=8 so the 16-row example exercises the multi-tile grid path.
    out = layer_norm(x, gamma, beta, eps=1e-6, block_rows=8)
    out = jax.block_until_ready(out)

    ref = layer_norm_reference(x, gamma, beta, eps=1e-6)
    np.testing.assert_allclose(np.asarray(out), np.asarray(ref),
                               rtol=1e-4, atol=1e-4)

    print("KERNEL_OK")
</pallas_src>

<mosaic_0001>
module attributes {stable_mosaic.version = 11 : i64} {
  func.func @layernorm_kernel(%arg0: i32, %arg1: memref<8x32xf32, #tpu.memory_space<vmem>>, %arg2: memref<1x32xf32, #tpu.memory_space<vmem>>, %arg3: memref<1x32xf32, #tpu.memory_space<vmem>>, %arg4: memref<8x32xf32, #tpu.memory_space<vmem>>) attributes {dimension_semantics = [#tpu.dimension_semantics<parallel>], iteration_bounds = array<i64: 2>, scalar_prefetch = 0 : i64, scratch_operands = 0 : i64, tpu.core_type = #tpu.core_type<tc>, window_params = [{transform_indices = @transform_0, window_bounds = array<i64: 8, 32>}, {pipeline_mode = #tpu.pipeline_mode<synchronous>, transform_indices = @transform_1, window_bounds = array<i64: 1, 32>}, {pipeline_mode = #tpu.pipeline_mode<synchronous>, transform_indices = @transform_2, window_bounds = array<i64: 1, 32>}, {transform_indices = @transform_3, window_bounds = array<i64: 8, 32>}]} {
    %c0 = arith.constant 0 : index
    %c0_0 = arith.constant 0 : index
    %0 = vector.load %arg1[%c0, %c0_0] : memref<8x32xf32, #tpu.memory_space<vmem>>, vector<8x32xf32>
    %cst = arith.constant dense<0.000000e+00> : vector<8xf32>
    %1 = vector.multi_reduction <add>, %0, %cst [1] : vector<8x32xf32> to vector<8xf32>
    %2 = vector.shape_cast %1 : vector<8xf32> to vector<8x1xf32>
    %3 = arith.mulf %0, %0 : vector<8x32xf32>
    %cst_1 = arith.constant dense<0.000000e+00> : vector<8xf32>
    %4 = vector.multi_reduction <add>, %3, %cst_1 [1] : vector<8x32xf32> to vector<8xf32>
    %5 = vector.shape_cast %4 : vector<8xf32> to vector<8x1xf32>
    %cst_2 = arith.constant 3.200000e+01 : f32
    %6 = vector.broadcast %cst_2 : f32 to vector<8x1xf32>
    %7 = arith.divf %2, %6 : vector<8x1xf32>
    %cst_3 = arith.constant 3.200000e+01 : f32
    %8 = vector.broadcast %cst_3 : f32 to vector<8x1xf32>
    %9 = arith.mulf %8, %7 : vector<8x1xf32>
    %10 = arith.mulf %9, %7 : vector<8x1xf32>
    %11 = arith.subf %5, %10 : vector<8x1xf32>
    %cst_4 = arith.constant 3.100000e+01 : f32
    %12 = vector.broadcast %cst_4 : f32 to vector<8x1xf32>
    %13 = arith.divf %11, %12 : vector<8x1xf32>
    %cst_5 = arith.constant 0.000000e+00 : f32
    %14 = vector.broadcast %cst_5 : f32 to vector<8x1xf32>
    %15 = arith.maximumf %13, %14 : vector<8x1xf32>
    %16 = math.sqrt %15 : vector<8x1xf32>
    %cst_6 = arith.constant 9.99999997E-7 : f32
    %17 = vector.broadcast %cst_6 : f32 to vector<8x1xf32>
    %18 = arith.addf %16, %17 : vector<8x1xf32>
    %cst_7 = arith.constant 1.000000e+00 : f32
    %19 = vector.broadcast %cst_7 : f32 to vector<8x1xf32>
    %20 = arith.divf %19, %18 : vector<8x1xf32>
    %c0_8 = arith.constant 0 : index
    %c0_9 = arith.constant 0 : index
    %21 = vector.load %arg2[%c0_8, %c0_9] : memref<1x32xf32, #tpu.memory_space<vmem>>, vector<1x32xf32>
    %22 = vector.broadcast %7 : vector<8x1xf32> to vector<8x32xf32>
    %23 = arith.subf %0, %22 : vector<8x32xf32>
    %24 = vector.broadcast %20 : vector<8x1xf32> to vector<8x32xf32>
    %25 = arith.mulf %23, %24 : vector<8x32xf32>
    %26 = vector.broadcast %21 : vector<1x32xf32> to vector<8x32xf32>
    %27 = arith.mulf %26, %25 : vector<8x32xf32>
    %c0_10 = arith.constant 0 : index
    %c0_11 = arith.constant 0 : index
    %28 = vector.load %arg3[%c0_10, %c0_11] : memref<1x32xf32, #tpu.memory_space<vmem>>, vector<1x32xf32>
    %29 = vector.broadcast %28 : vector<1x32xf32> to vector<8x32xf32>
    %30 = arith.addf %27, %29 : vector<8x32xf32>
    %c0_12 = arith.constant 0 : index
    %c0_13 = arith.constant 0 : index
    %31 = vector.load %arg4[%c0_12, %c0_13] : memref<8x32xf32, #tpu.memory_space<vmem>>, vector<8x32xf32>
    tpu.vector_store %arg4[%c0_12, %c0_13], %30 {strides = array<i32>} : memref<8x32xf32, #tpu.memory_space<vmem>>, vector<8x32xf32>,
    return
  }
  func.func @transform_0(%arg0: i32) -> (i32, i32) {
    %c0_i32 = arith.constant 0 : i32
    %c0_i32_0 = arith.constant 0 : i32
    return %arg0, %c0_i32 : i32, i32
  }
  func.func @transform_1(%arg0: i32) -> (i32, i32) {
    %c0_i32 = arith.constant 0 : i32
    %c0_i32_0 = arith.constant 0 : i32
    %c0_i32_1 = arith.constant 0 : i32
    return %c0_i32, %c0_i32_0 : i32, i32
  }
  func.func @transform_2(%arg0: i32) -> (i32, i32) {
    %c0_i32 = arith.constant 0 : i32
    %c0_i32_0 = arith.constant 0 : i32
    %c0_i32_1 = arith.constant 0 : i32
    return %c0_i32, %c0_i32_0 : i32, i32
  }
  func.func @transform_3(%arg0: i32) -> (i32, i32) {
    %c0_i32 = arith.constant 0 : i32
    %c0_i32_0 = arith.constant 0 : i32
    return %arg0, %c0_i32 : i32, i32
  }
}

</mosaic_0001>

<bundles_post_ra>
// kernel: tpu_custom_call.1
= control target key start
LH: loop header
LB: loop body
LE: loop exit
PB: predicated region body
PF: predicated region fallthrough
CT: control target
= control target key end

     0   :  { %8 = vsyncpa [#allocation3], 0  ;;  %s761_s0 = inlined_call_operand.hbm [shape: f32[16,32], index: 0, kind: input, shape index: {}]   ;;  %s762_s1 = inlined_call_operand.hbm [shape: f32[1,32], index: 1, kind: input, shape index: {}]   ;;  %s763_s2 = inlined_call_operand.vmem [shape: f32[1,32], index: 2, kind: input, shape index: {}]   ;;  %s764_s3 = inlined_call_operand.hbm [shape: f32[16,32], index: 3, kind: output, shape index: {}]  }
   0x1   :  { %10 = vsyncpa [#allocation3 + $0x1], 0 }
   0x2   :  { %11 = vsyncpa [#allocation6], 0 }
   0x3   :  { %12 = vsyncpa [#allocation4], 0 }
   0x4   :  { %14 = vsyncpa [#allocation4 + $0x1], 0  ;;  %s607_s12 = smov 0   ;;  %s609_s13 = smov 0  }
   0x5   :  { %s611_s14 = smov 0   ;;  %s613_s15 = smov 0  }
   0x6 LB: > { %s628_s16 = sadd.s32 4294967295, %s582_s15   ;;  %s369_s17 = sadd.s32 4294967294, %s582_s15   ;;  %s582_s15 = sphi %s613_s15, %s774_s15   ;;  %s578_s14 = sphi %s611_s14, %s773_s14   ;;  %s574_s13 = sphi %s609_s13, %s772_s13   ;;  %s570_s12 = sphi %s607_s12, %s771_s12  }
   0x7   : > { %p40_p0 = scmp.ne.s32.totalorder %s574_s13, %s570_s12  ;;  %p41_p1 = scmp.eq.s32.totalorder %s628_s16, 0 }
   0x8   : > { %p106_p2 = scmp.eq.s32.totalorder %s628_s16, 1  ;;  %p112_p3 = scmp.eq.s32.totalorder %s369_s17, 1 }
   0x9   : > { %p637_p4 = por %p41_p1, %p40_p0  ;;  %p370_p5 = scmp.ge.s32.totalorder %s582_s15, 1 }
   0xa   : > { %p642_p6 = por %p112_p3, %p40_p0  ;;  %p119_p7 = scmp.lt.s32.totalorder %s582_s15, 3 }
   0xb   : > { %s131_s22 = sshll.u32 %s762_s1, 4  ;;  %s584_s24 = smov [#allocation5]   ;;  %s132_s22 = int_to_ptr.hbm [resolvable:$true] %s131_s22 }
   0xc   : > { %p650_p8 = pnand %p370_p5, %p119_p7  ;;  %s133_s25 = sshll.u32 %s584_s24, 4  ;;  %s134_s25 = int_to_ptr.vmem [resolvable:$true] %s133_s25 }
   0xd   : > { %s660_s26 = sadd.s32 1, %s582_s15   ;;  %s27_s27 = sadd.s32 1, %s578_s14 }
   0xe   : > { %p391_p10 = pneg %p650_p8  ;;  %s24_s28 = ssub.s32 %s582_s15, %s660_s26 }
   0xf   : > { %p25_p12 = scmp.eq.s32.totalorder %s24_s28, 0  ;;  %p34_p13 = scmp.ne.s32.totalorder %s578_s14, %s574_s13 }
  0x10   : > { %p392_p11 = pnand %p391_p10, %p41_p1  ;;  %p35_p0 = scmp.eq.s32.totalorder %s582_s15, 0 }
  0x11   : > { %s669_s29 = scalar_select %p25_p12, %s578_s14, %s27_s27  }
  0x12   : > { %394 = dma.hbm_to_vmem [thread:$0]  (!%p392_p11), %s132_s22, 16, %s134_s25, [#allocation6]  }
  0x13   : > { %p673_p3 = por %p106_p2, %p34_p13  ;;  %p404_p5 = scmp.lt.s32.totalorder %s582_s15, 2 }
  0x14   : > { %s147_s4 = sand.u32 1, %s578_s14   ;;  %s374_s5 = sshll.u32 %s582_s15, 3 }
  0x15   : > { %p36_p7 = por %p35_p0, %p34_p13  ;;  %s373_s6 = sshll.u32 %s147_s4, 3 }
  0x16   : > { %s155_s9 = scalar_lea.hbm %s761_s0, %s374_s5  ;;  %s151_s11 = scalar_lea.vmem [#allocation2], %s373_s6 }
  0x17   : > { %s157_s10 = sshll.u32 %s155_s9, 4  ;;  %s159_s17 = sshll.u32 %s151_s11, 4  ;;  %s158_s10 = int_to_ptr.hbm [resolvable:$true] %s157_s10  ;;  %s160_s17 = int_to_ptr.vmem [resolvable:$true] %s159_s17 }
  0x18   : > { %p683_p10 = pnand %p404_p5, %p36_p7  ;;  %s148_s21 = scalar_lea.sflag [#allocation3], %s147_s4 }
  0x19   : > { %s482_s22 = sshra.s32 %s158_s10, 4  ;;  %s489_s28 = scalar_lea.hbm %s761_s0, 16  ;;  %s483_s22 = int_to_ptr.hbm [resolvable:$true] %s482_s22 }
  0x1a   : > { %s484_s24 = scalar_lea.hbm %s483_s22, 8  ;;  %p486_p11 = pneg %p683_p10 }
  0x1b   : > { %p485_p2 = scmp.ne.s32.totalorder %s483_s22, %s484_s24  ;;  %p490_p0 = scmp.lt.s32.totalorder %s483_s22, %s761_s0 }
  0x1c   : > { %p491_p5 = scmp.lt.s32.totalorder %s489_s28, %s484_s24 }
  0x1d   : > { %p487_p12 = pnand %p486_p11, %p485_p2 }
  0x1e   : > { %p492_p7 = por %p491_p5, %p490_p0 }
  0x1f   : > { %p488_p13 = pneg %p487_p12 }
  0x21   : > { %p493_p9 = pnand %p492_p7, %p488_p13 }
  0x23   : > { %496 = shalt.err (!%p493_p9)
}
  0x24   : > { %398 = dma.hbm_to_vmem [thread:$0]  (!%p683_p10), %s158_s10, 128, %s160_s17, %s148_s21  }
  0x25   : > { %168 = sbr.rel (%p650_p8) target bundleno = 226 (0xe2), region = 32  ;;  %s700_s4 = sand.u32 (!%p650_p8), 1, %s574_s13  }
  0x26   : > { %s376_s7 = sshll.u32 (!%p650_p8), %s700_s4, 3  ;;  %s171_s8 = scalar_lea.sflag (!%p650_p8), [#allocation3], %s700_s4 }
  0x27   : > { %s174_s9 = scalar_lea.vmem (!%p650_p8), [#allocation2], %s376_s7 }
  0x2a   : > { %557 = dma.done.wait (%p637_p4), %s171_s8, 128  }
  0x2b   : > { %559 = vsyncadd (%p637_p4), %s171_s8, 4294967168 }
  0x2c   : > { %561 = dma.done.wait (%p41_p1), [#allocation6], 16  }
  0x2d   : > { %563 = vsyncadd (%p41_p1), [#allocation6], 4294967280  ;;  %vm204_vm0 = vcmask 261120   ;;  %v714_v0 = vld [vmem:[%s174_s9] sm:$0xff]  ;;  %v585_v4 = vmov 32.0   ;;  %v586_v7 = vmov 31.0  }
  0x2e   : > { %v205_v1 = vsel %vm204_vm0, %v714_v0, 0.0  ;;  %v208_v2 = vmul.f32 %v714_v0, %v714_v0  ;;  %444 = vrcp.f32 %v585_v4  ;;  %s380_s18 = sshll.u32 %s628_s16, 3  ;;  %v442_v47 = vld [vmem:[#allocation5] ss:$0 sm:$0xff]  ;;  %v443_v50 = vld [vmem:[%s763_s2] ss:$0 sm:$0xff] }
  0x2f   : > { %206 = vadd.xlane.f32.xlu0 %v205_v1  ;;  %446 = vrcp.f32 %v586_v7  ;;  %s284_s11 = scalar_lea.hbm %s764_s3, %s380_s18  ;;  %s202_s16 = scalar_lea.vmem [#allocation7], %s376_s7 }
  0x30   : > { %v209_v3 = vsel %vm204_vm0, %v208_v2, 0.0  ;;  %s286_s21 = sshll.u32 %s202_s16, 4  ;;  %s288_s22 = sshll.u32 %s284_s11, 4  ;;  %s287_s21 = int_to_ptr.vmem [resolvable:$true] %s286_s21  ;;  %s289_s22 = int_to_ptr.hbm [resolvable:$true] %s288_s22 }
  0x31   : > { %s274_s24 = scalar_lea.sflag [#allocation4], %s700_s4  ;;  %s526_s25 = sshra.s32 %s289_s22, 4  ;;  %s527_s25 = int_to_ptr.hbm [resolvable:$true] %s526_s25 }
  0x32   : > { %s528_s27 = scalar_lea.hbm %s527_s25, 8  ;;  %s532_s6 = scalar_lea.hbm %s764_s3, 16 }
  0x33   : > { %p529_p1 = scmp.ne.s32.totalorder %s527_s25, %s528_s27  ;;  %p533_p9 = scmp.lt.s32.totalorder %s527_s25, %s764_s3 }
  0x34   : > { %v445_v5 = vpop.eup %444  ;;  %p534_p10 = scmp.lt.s32.totalorder %s532_s6, %s528_s27 }
  0x35   : > { %v213_v6 = vmul.f32 32.0, %v445_v5  ;;  %v447_v9 = vpop.eup %446  ;;  %vm217_vm1 = vweird.f32 %v445_v5  ;;  %p530_p4 = pnand %p529_p1, %p673_p3 }
  0x36   : > { %v224_v11 = vmul.f32 31.0, %v447_v9  ;;  %vm228_vm2 = vweird.f32 %v447_v9  ;;  %p535_p2 = por %p534_p10, %p533_p9 }
  0x37   : > { %210 = vadd.xlane.f32.xlu0 %v209_v3  ;;  %v214_v8 = vsub.f32 1.0, %v213_v6  ;;  %p531_p8 = pneg %p530_p4 }
  0x38   : > { %v225_v13 = vsub.f32 1.0, %v224_v11 }
  0x39   : > { %v215_v10 = vmul.f32 %v445_v5, %v214_v8  ;;  %p536_p11 = pnand %p535_p2, %p531_p8 }
  0x3a   : > { %v226_v16 = vmul.f32 %v447_v9, %v225_v13 }
  0x3b   : > { %v216_v12 = vadd.f32 %v445_v5, %v215_v10 }
  0x3c   : > { %v227_v19 = vadd.f32 %v447_v9, %v226_v16 }
  0x3d   : > { %v218_v14 = vsel %vm217_vm1, %v445_v5, %v216_v12 }
  0x3e   : > { %v229_v21 = vsel %vm228_vm2, %v447_v9, %v227_v19 }
  0xa2   : > { %v207_v15 = vpop.xlane.xlu0 %206 }
  0xa3   : > { %v219_v17 = vmul.f32 %v218_v14, %v207_v15 }
  0xa5   : > { %v220_v18 = vmul.f32 32.0, %v219_v17  ;;  %v261_v45 = vsub.f32 %v714_v0, %v219_v17 }
  0xa7   : > { %v221_v20 = vmul.f32 %v220_v18, %v219_v17 }
  0xaa   : > { %v211_v22 = vpop.xlane.xlu0 %210 }
  0xab   : > { %v222_v23 = vsub.f32 %v211_v22, %v221_v20 }
  0xad   : > { %v230_v24 = vmul.f32 %v229_v21, %v222_v23 }
  0xaf   : > { %v231_v25 = vmax.f32 %v230_v24, 0.0 }
  0xb1   : > { %448 = vrsqrt.f32 %v231_v25  ;;  %vm239_vm3 = vcmp.eq.f32.partialorder %v231_v25, inf  ;;  %v242_v33 = vand.u32 2147483648, %v231_v25  ;;  %vm241_vm4 = vcmp.eq.f32.partialorder %v231_v25, 0.0 }
  0xb7   : > { %v449_v26 = vpop.eup %448 }
  0xb8   : > { %v233_v27 = vmul.f32 %v449_v26, %v231_v25 }
  0xba   : > { %v234_v28 = vmul.f32 %v449_v26, %v233_v27 }
  0xbc   : > { %v235_v29 = vmul.f32 0.5, %v234_v28 }
  0xbe   : > { %v236_v30 = vsub.f32 1.5, %v235_v29 }
  0xc0   : > { %v237_v31 = vmul.f32 %v449_v26, %v236_v30 }
  0xc2   : > { %v238_v32 = vmul.f32 %v237_v31, %v231_v25 }
  0xc4   : > { %v240_v34 = vsel %vm239_vm3, %v231_v25, %v238_v32 }
  0xc5   : > { %v243_v35 = vsel %vm241_vm4, %v242_v33, %v240_v34 }
  0xc6   : > { %v244_v36 = vadd.f32 1e-06, %v243_v35 }
  0xc8   : > { %450 = vrcp.f32 %v244_v36  ;;  %v256_v40 = vand.u32 2147483648, %v244_v36  ;;  %v254_v42 = vand.u32 2147483647, %v244_v36  ;;  %vm250_vm6 = vweird.f32 %v244_v36 }
  0xca   : > { %v257_v44 = vor.u32 1.1754944e-38, %v256_v40  ;;  %vm255_vm8 = vcmp.eq.f32.partialorder %v254_v42, 8.507059e+37 }
  0xce   : > { %v451_v37 = vpop.eup %450 }
  0xcf   : > { %v246_v38 = vmul.f32 %v451_v37, %v244_v36  ;;  %vm251_vm5 = vweird.f32 %v451_v37 }
  0xd0   : > { %vm252_vm7 = vmor %vm250_vm6, %vm251_vm5 }
  0xd1   : > { %v247_v39 = vsub.f32 1.0, %v246_v38 }
  0xd3   : > { %v248_v41 = vmul.f32 %v451_v37, %v247_v39 }
  0xd5   : > { %v249_v43 = vadd.f32 %v451_v37, %v248_v41 }
  0xd7   : > { %v253_v46 = vsel %vm252_vm7, %v451_v37, %v249_v43 }
  0xd8   : > { %v258_v48 = vsel %vm255_vm8, %v257_v44, %v253_v46 }
  0xd9   : > { %v262_v49 = vmul.f32 %v261_v45, %v258_v48 }
  0xdb   : > { %v266_v51 = vmul.f32 %v442_v47, %v262_v49 }
  0xdd   : > { %v271_v52 = vadd.f32 %v443_v50, %v266_v51 }
  0xdf   : > { %272 = vst.msk [vmem:[%s202_s16] sm:$0xff] %vm204_vm0, %v271_v52 }
  0xe0   : > { %539 = shalt.err (!%p536_p11)
}
  0xe1   : > { %389 = dma.vmem_to_hbm [thread:$0]  (%p673_p3), %s287_s21, 128, %s289_s22, %s274_s24  }
  0xe2 PF: > { %s300_s4 = sand.u32 1, %s570_s12   ;;  %p770_p12 = scmp.ge.s32.totalorder %s582_s15, 2 }
  0xe3   : > { %s301_s9 = scalar_lea.sflag [#allocation4], %s300_s4 }
  0xe4   : > { %p400_p13 = pnand %p770_p12, %p642_p6 }
  0xe6   : > { %p401_p0 = pneg %p400_p13 }
  0xe8   : > { %565 = dma.done.wait (%p401_p0), %s301_s9, 128  }
  0xe9   : > { %567 = vsyncadd (%p401_p0), %s301_s9, 4294967168  ;;  %p17_p5 = scmp.ge.s32.totalorder %s660_s26, 4   ;;  %s771_s12 = smov %s574_s13 }
  0xea   : > { %s772_s13 = smov %s578_s14  ;;  %s773_s14 = smov %s669_s29 }
  0xeb   : > { %s774_s15 = smov %s660_s26  ;;  %19 = sbr.rel (!%p17_p5) target bundleno = 6 (0x6), region = 81 }
  0xf0   :  { %307 = vsyncpa [#allocation3], 1 }
  0xf1   :  { %309 = vsyncpa [#allocation3 + $0x1], 1 }
  0xf2   :  { %310 = vsyncpa [#allocation6], 1 }
  0xf3   :  { %311 = vsyncpa [#allocation4], 1 }
  0xf4   :  { %313 = vsyncpa [#allocation4 + $0x1], 1 }

</bundles_post_ra>
